<compile_context>
chip_gen: v7x
topology: tpu7x:2x2x1
jax: 0.10.0
libtpu: 0.0.40
codegen_flags: <defaults>
</compile_context>

<pallas_src>
import functools

import jax
import jax.numpy as jnp
from jax.experimental import pallas as pl
from jax.experimental.pallas import tpu as pltpu


# ----------------------------- Pallas kernel -------------------------------


def _layernorm_kernel(x_ref, g_ref, b_ref, o_ref, *, eps, d_model):
    x = x_ref[...].astype(jnp.float32)                      # (TM, D)
    # Single-pass row moments: sum and sum-of-squares in one traversal.
    s1 = jnp.sum(x, axis=-1, keepdims=True)                 # (TM, 1)
    s2 = jnp.sum(x * x, axis=-1, keepdims=True)             # (TM, 1)
    mean = s1 * (1.0 / d_model)
    # torch.std default is unbiased (Bessel: divide by D-1); clamp rounding.
    var = jnp.maximum((s2 - mean * s1) / (d_model - 1), 0.0)
    std = jnp.sqrt(var)
    denom = std + eps
    # EUP approximate reciprocal (free slot) + one Newton step -> f32 accuracy.
    r = pl.reciprocal(denom, approx=True)
    inv = r * (2.0 - denom * r)                             # (TM, 1)
    g = g_ref[...].astype(jnp.float32)                      # (1, D), resident
    b = b_ref[...].astype(jnp.float32)
    o_ref[...] = ((x - mean) * (inv * g) + b).astype(o_ref.dtype)


# ------------------------------ JAX wrappers --------------------------------


def _sublane_multiple(dtype):
    itemsize = jnp.dtype(dtype).itemsize
    return {4: 8, 2: 16, 1: 32}.get(itemsize, 8)


def _tpu_params():
    """Generation-aware VMEM budgeting / grid splitting.

    v7x: 64 MiB VMEM per TensorCore, 2 TCs/chip -> small tile budget (counting
         in-kernel f32 temporaries), conservative vmem limit, and >= 4 grid
         steps so the "parallel" row axis shards across both cores.
    v5e / v6e: 128 MiB VMEM, 1 TC -> large tiles, no split needed.
    Unknown: conservative defaults that fit every generation.
    """
    try:
        kind = jax.devices()[0].device_kind.lower()
    except Exception:
        kind = ""
    if "v7" in kind:
        return dict(vmem_budget=24 << 20, vmem_limit=48 << 20, min_steps=4)
    if "v6" in kind or "v5" in kind:
        return dict(vmem_budget=80 << 20, vmem_limit=100 << 20, min_steps=1)
    return dict(vmem_budget=24 << 20, vmem_limit=48 << 20, min_steps=2)


def _choose_row_tile(n_rows, d, dtype):
    """Pick the row tile TM and the vmem limit for the current TPU generation.

    Per-row VMEM cost = double-buffered input + output tiles (4 * itemsize * D)
    plus ~3 (TM, D) f32 temporaries materialized in the body (3 * 4 * D).
    """
    params = _tpu_params()
    sub = _sublane_multiple(dtype)
    itemsize = jnp.dtype(dtype).itemsize
    bytes_per_row = d * (4 * itemsize + 3 * 4)

    tm = max(sub, min(1024, params["vmem_budget"] // bytes_per_row))
    # Don't tile past the (sublane-rounded) row count.
    n_up = ((n_rows + sub - 1) // sub) * sub
    tm = min(tm, n_up)
    # v7x: guarantee enough grid steps for both TensorCores (no-op elsewhere).
    min_steps = params["min_steps"]
    if min_steps > 1 and n_up > sub:
        tm = min(tm, max(sub, n_up // min_steps))
    tm = max(sub, (tm // sub) * sub)
    return tm, params["vmem_limit"]


def pallas_layernorm(x, gamma, beta, eps=1e-6, donate_input=False):
    """x: (..., D). Torch-style LayerNorm along the last axis as a row-tiled
    Pallas kernel. No padding: the last grid block is ragged (masked writes)."""
    orig_shape = x.shape
    d = orig_shape[-1]
    assert d > 1, "d_model must be > 1 (Bessel-corrected std divides by D-1)"
    # NOTE: for lane-dense stores D should be a multiple of 128 in production
    # (512/768/4096 all qualify); smaller D still compiles (full-extent block).

    x2d = x.reshape(-1, d)
    n = x2d.shape[0]

    tm, vmem_limit = _choose_row_tile(n, d, x2d.dtype)

    g2d = gamma.reshape(1, d)
    b2d = beta.reshape(1, d)

    kernel = functools.partial(_layernorm_kernel, eps=eps, d_model=d)
    itemsize = jnp.dtype(x2d.dtype).itemsize
    cost = pl.CostEstimate(
        flops=7 * n * d,
        transcendentals=2 * n,                          # sqrt + reciprocal per row
        bytes_accessed=2 * n * d * itemsize + 2 * d * 4,
    )

    out = pl.pallas_call(
        kernel,
        out_shape=jax.ShapeDtypeStruct((n, d), x2d.dtype),
        grid_spec=pl.GridSpec(
            grid=(pl.cdiv(n, tm),),                     # ragged last block OK
            in_specs=[
                pl.BlockSpec((tm, d), lambda i: (i, 0)),
                pl.BlockSpec((1, d), lambda i: (0, 0)),  # gamma resident
                pl.BlockSpec((1, d), lambda i: (0, 0)),  # beta resident
            ],
            out_specs=pl.BlockSpec((tm, d), lambda i: (i, 0)),
        ),
        compiler_params=pltpu.CompilerParams(
            dimension_semantics=("parallel",),          # megacore split on v7x
            vmem_limit_bytes=vmem_limit,
        ),
        cost_estimate=cost,
        # P8: alias output onto the input when the activation is dead after the
        # norm (e.g. inside a jitted transformer stack). Off by default so the
        # eager demo's input stays valid.
        input_output_aliases={0: 0} if donate_input else {},
    )(x2d, g2d, b2d)

    return out.reshape(orig_shape)


def encoder_forward(x, mask, layer_fns, gamma, beta, eps=1e-6):
    """Encoder.forward: apply each layer (plain JAX callables, so residual adds
    etc. fuse into their matmuls via XLA), then the final Pallas LayerNorm."""
    # TODO(synk): EncoderLayer internals (self-attention + FFN sublayers) are
    # generic user-supplied modules in the original code; they stay plain JAX.
    for layer_fn in layer_fns:
        x = layer_fn(x, mask)
    return pallas_layernorm(x, gamma, beta, eps)


# ---------------------------------- main ------------------------------------

if __name__ == "__main__":
    B, S, D = 2, 8, 512          # batch, seq, d_model (R2Gen d_model = 512)
    N_LAYERS = 3

    key = jax.random.PRNGKey(0)
    kx, *kws = jax.random.split(key, 1 + N_LAYERS)

    x = jax.random.normal(kx, (B, S, D), dtype=jnp.float32)
    mask = jnp.ones((B, S), dtype=jnp.float32)

    # Deterministic stand-in encoder layers (the real EncoderLayer is a
    # caller-supplied module; here: masked residual tanh-projection).
    ws = [jax.random.normal(k, (D, D), dtype=jnp.float32) * 0.02 for k in kws]

    def make_layer(w):
        def layer_fn(h, m):
            return h + m[..., None] * jnp.tanh(jnp.einsum("bsd,de->bse", h, w))
        return layer_fn

    layer_fns = [make_layer(w) for w in ws]

    # Final LayerNorm parameters (torch init: ones / zeros).
    gamma = jnp.ones((D,), dtype=jnp.float32)
    beta = jnp.zeros((D,), dtype=jnp.float32)

    out = encoder_forward(x, mask, layer_fns, gamma, beta, eps=1e-6)
    out = jax.block_until_ready(out)

    # Pure-JAX reference (same torch-style LayerNorm semantics).
    h = x
    for fn in layer_fns:
        h = fn(h, mask)
    hf = h.astype(jnp.float32)
    mean = hf.mean(-1, keepdims=True)
    std = jnp.sqrt(((hf - mean) ** 2).sum(-1, keepdims=True) / (D - 1))
    ref = gamma * (hf - mean) / (std + 1e-6) + beta

    assert out.shape == (B, S, D)
    assert jnp.allclose(out, ref, atol=2e-5, rtol=2e-5), (
        float(jnp.max(jnp.abs(out - ref)))
    )

    print("KERNEL_OK")
</pallas_src>

<mosaic_0001>
module attributes {stable_mosaic.version = 11 : i64} {
  func.func @_layernorm_kernel(%arg0: i32, %arg1: memref<8x512xf32, #tpu.memory_space<vmem>>, %arg2: memref<1x512xf32, #tpu.memory_space<vmem>>, %arg3: memref<1x512xf32, #tpu.memory_space<vmem>>, %arg4: memref<8x512xf32, #tpu.memory_space<vmem>>) attributes {dimension_semantics = [#tpu.dimension_semantics<parallel>], iteration_bounds = array<i64: 2>, scalar_prefetch = 0 : i64, scratch_operands = 0 : i64, tpu.core_type = #tpu.core_type<tc>, window_params = [{transform_indices = @transform_0, window_bounds = array<i64: 8, 512>}, {pipeline_mode = #tpu.pipeline_mode<synchronous>, transform_indices = @transform_1, window_bounds = array<i64: 1, 512>}, {pipeline_mode = #tpu.pipeline_mode<synchronous>, transform_indices = @transform_2, window_bounds = array<i64: 1, 512>}, {transform_indices = @transform_3, window_bounds = array<i64: 8, 512>}]} {
    %c0 = arith.constant 0 : index
    %c0_0 = arith.constant 0 : index
    %0 = vector.load %arg1[%c0, %c0_0] : memref<8x512xf32, #tpu.memory_space<vmem>>, vector<8x512xf32>
    %cst = arith.constant dense<0.000000e+00> : vector<8xf32>
    %1 = vector.multi_reduction <add>, %0, %cst [1] : vector<8x512xf32> to vector<8xf32>
    %2 = vector.shape_cast %1 : vector<8xf32> to vector<8x1xf32>
    %3 = arith.mulf %0, %0 : vector<8x512xf32>
    %cst_1 = arith.constant dense<0.000000e+00> : vector<8xf32>
    %4 = vector.multi_reduction <add>, %3, %cst_1 [1] : vector<8x512xf32> to vector<8xf32>
    %5 = vector.shape_cast %4 : vector<8xf32> to vector<8x1xf32>
    %cst_2 = arith.constant 0.001953125 : f32
    %6 = vector.broadcast %cst_2 : f32 to vector<8x1xf32>
    %7 = arith.mulf %2, %6 : vector<8x1xf32>
    %8 = arith.mulf %7, %2 : vector<8x1xf32>
    %9 = arith.subf %5, %8 : vector<8x1xf32>
    %cst_3 = arith.constant 5.110000e+02 : f32
    %10 = vector.broadcast %cst_3 : f32 to vector<8x1xf32>
    %11 = arith.divf %9, %10 : vector<8x1xf32>
    %cst_4 = arith.constant 0.000000e+00 : f32
    %12 = vector.broadcast %cst_4 : f32 to vector<8x1xf32>
    %13 = arith.maximumf %11, %12 : vector<8x1xf32>
    %14 = math.sqrt %13 : vector<8x1xf32>
    %cst_5 = arith.constant 9.99999997E-7 : f32
    %15 = vector.broadcast %cst_5 : f32 to vector<8x1xf32>
    %16 = arith.addf %14, %15 : vector<8x1xf32>
    %17 = tpu.reciprocal %16 {approx = true} : vector<8x1xf32> -> vector<8x1xf32>
    %18 = arith.mulf %16, %17 : vector<8x1xf32>
    %cst_6 = arith.constant 2.000000e+00 : f32
    %19 = vector.broadcast %cst_6 : f32 to vector<8x1xf32>
    %20 = arith.subf %19, %18 : vector<8x1xf32>
    %21 = arith.mulf %17, %20 : vector<8x1xf32>
    %c0_7 = arith.constant 0 : index
    %c0_8 = arith.constant 0 : index
    %22 = vector.load %arg2[%c0_7, %c0_8] : memref<1x512xf32, #tpu.memory_space<vmem>>, vector<1x512xf32>
    %c0_9 = arith.constant 0 : index
    %c0_10 = arith.constant 0 : index
    %23 = vector.load %arg3[%c0_9, %c0_10] : memref<1x512xf32, #tpu.memory_space<vmem>>, vector<1x512xf32>
    %24 = vector.broadcast %7 : vector<8x1xf32> to vector<8x512xf32>
    %25 = arith.subf %0, %24 : vector<8x512xf32>
    %26 = vector.broadcast %21 : vector<8x1xf32> to vector<8x512xf32>
    %27 = vector.broadcast %22 : vector<1x512xf32> to vector<8x512xf32>
    %28 = arith.mulf %26, %27 : vector<8x512xf32>
    %29 = arith.mulf %25, %28 : vector<8x512xf32>
    %30 = vector.broadcast %23 : vector<1x512xf32> to vector<8x512xf32>
    %31 = arith.addf %29, %30 : vector<8x512xf32>
    %c0_11 = arith.constant 0 : index
    %c0_12 = arith.constant 0 : index
    %32 = vector.load %arg4[%c0_11, %c0_12] : memref<8x512xf32, #tpu.memory_space<vmem>>, vector<8x512xf32>
    tpu.vector_store %arg4[%c0_11, %c0_12], %31 {strides = array<i32>} : memref<8x512xf32, #tpu.memory_space<vmem>>, vector<8x512xf32>,
    return
  }
  func.func @transform_0(%arg0: i32) -> (i32, i32) {
    %c0_i32 = arith.constant 0 : i32
    %c0_i32_0 = arith.constant 0 : i32
    return %arg0, %c0_i32 : i32, i32
  }
  func.func @transform_1(%arg0: i32) -> (i32, i32) {
    %c0_i32 = arith.constant 0 : i32
    %c0_i32_0 = arith.constant 0 : i32
    %c0_i32_1 = arith.constant 0 : i32
    return %c0_i32, %c0_i32_0 : i32, i32
  }
  func.func @transform_2(%arg0: i32) -> (i32, i32) {
    %c0_i32 = arith.constant 0 : i32
    %c0_i32_0 = arith.constant 0 : i32
    %c0_i32_1 = arith.constant 0 : i32
    return %c0_i32, %c0_i32_0 : i32, i32
  }
  func.func @transform_3(%arg0: i32) -> (i32, i32) {
    %c0_i32 = arith.constant 0 : i32
    %c0_i32_0 = arith.constant 0 : i32
    return %arg0, %c0_i32 : i32, i32
  }
}

</mosaic_0001>

<bundles_post_ra>
// kernel: tpu_custom_call.1
= control target key start
LH: loop header
LB: loop body
LE: loop exit
PB: predicated region body
PF: predicated region fallthrough
CT: control target
= control target key end

     0   :  { %8 = vsyncpa [#allocation3], 0  ;;  %s853_s0 = inlined_call_operand.hbm [shape: f32[16,512], index: 0, kind: input, shape index: {}]   ;;  %s854_s1 = inlined_call_operand.hbm [shape: f32[1,512], index: 1, kind: input, shape index: {}]   ;;  %s855_s2 = inlined_call_operand.vmem [shape: f32[1,512], index: 2, kind: input, shape index: {}]   ;;  %s856_s3 = inlined_call_operand.hbm [shape: f32[16,512], index: 3, kind: output, shape index: {}]  }
   0x1   :  { %10 = vsyncpa [#allocation3 + $0x1], 0 }
   0x2   :  { %11 = vsyncpa [#allocation6], 0 }
   0x3   :  { %12 = vsyncpa [#allocation4], 0 }
   0x4   :  { %14 = vsyncpa [#allocation4 + $0x1], 0  ;;  %s627_s12 = smov 0   ;;  %s629_s13 = smov 0  }
   0x5   :  { %s631_s14 = smov 0   ;;  %s633_s15 = smov 0  }
   0x6 LB: > { %s648_s16 = sadd.s32 4294967295, %s602_s15   ;;  %s395_s17 = sadd.s32 4294967294, %s602_s15   ;;  %s602_s15 = sphi %s633_s15, %s880_s15   ;;  %s598_s14 = sphi %s631_s14, %s879_s14   ;;  %s594_s13 = sphi %s629_s13, %s878_s13   ;;  %s590_s12 = sphi %s627_s12, %s877_s12  }
   0x7   : > { %p40_p0 = scmp.ne.s32.totalorder %s594_s13, %s590_s12  ;;  %p857_p1 = scmp.eq.s32.totalorder %s648_s16, 0 }
   0x8   : > { %p112_p3 = scmp.eq.s32.totalorder %s395_s17, 1  ;;  %p396_p5 = scmp.ge.s32.totalorder %s602_s15, 1 }
   0x9   : > { %p657_p4 = por %p857_p1, %p40_p0  ;;  %p119_p7 = scmp.lt.s32.totalorder %s602_s15, 3 }
   0xa   : > { %p662_p6 = por %p112_p3, %p40_p0  ;;  %s604_s21 = smov [#allocation5]  }
   0xb   : > { %s860_s18 = scalar_select %p657_p4, 1, 0 }
   0xc   : > { %s861_s19 = scalar_select %p662_p6, 1, 0 }
   0xd   : > { %p667_p8 = pnand %p396_p5, %p119_p7  ;;  %s132_s22 = sshll.u32 %s604_s21, 4  ;;  %s133_s22 = int_to_ptr.vmem [resolvable:$true] %s132_s22 }
   0xe   : > { %s675_s23 = sadd.s32 1, %s602_s15   ;;  %s27_s27 = sadd.s32 1, %s598_s14 }
   0xf   : > { %s862_s20 = scalar_select %p667_p8, 1, 0 }
  0x10   : > { %p421_p10 = pneg %p667_p8  ;;  %s24_s25 = ssub.s32 %s602_s15, %s675_s23 }
  0x11   : > { %p685_p12 = scmp.eq.s32.totalorder %s24_s25, 0  ;;  %s474_s30 = scalar_lea.hbm %s854_s1, 64 }
  0x12   : > { %p679_p11 = pnand %p421_p10, %p857_p1  ;;  %p475_p0 = scmp.ne.s32.totalorder %s854_s1, %s474_s30 }
  0x13   : > { %s864_s26 = scalar_select %p685_p12, 1, 0 }
  0x14   : > { %p476_p3 = pneg %p679_p11  ;;  %p481_p10 = scmp.lt.u32.totalorder %s474_s30, %s854_s1 }
  0x16   : > { %p477_p5 = pnand %p476_p3, %p475_p0 }
  0x18   : > { %p478_p7 = pneg %p477_p5 }
  0x1a   : > { %p483_p9 = pnand %p481_p10, %p478_p7 }
  0x1c   : > { %486 = shalt.err (!%p483_p9)
}
  0x1d   : > { %s487_s8 = scalar_lea.vmem %s133_s22, 64  ;;  %p495_p6 = scmp.lt.s32.totalorder %s133_s22, %s133_s22 }
  0x1e   : > { %p488_p1 = scmp.ne.s32.totalorder %s133_s22, %s487_s8  ;;  %p496_p4 = scmp.lt.s32.totalorder %s487_s8, %s487_s8 }
  0x20   : > { %p490_p2 = pnand %p488_p1, %p476_p3  ;;  %p497_p8 = por %p496_p4, %p495_p6 }
  0x22   : > { %p491_p13 = pneg %p490_p2 }
  0x24   : > { %p498_p12 = pnand %p497_p8, %p491_p13 }
  0x26   : > { %501 = shalt.err (!%p498_p12)
}
  0x27   : > { %424 = dma.hbm_to_vmem [thread:$0]  (!%p679_p11), %s854_s1, 64, %s133_s22, [#allocation6]  }
  0x28   : > { %p865_p1 = scmp.ne.s32.totalorder %s864_s26, 0  ;;  %p35_p2 = scmp.eq.s32.totalorder %s602_s15, 0 }
  0x29   : > { %p866_p4 = scmp.ne.s32.totalorder %s598_s14, %s594_s13  ;;  %p867_p6 = scmp.eq.s32.totalorder %s648_s16, 1 }
  0x2a   : > { %s711_s11 = scalar_select %p865_p1, %s598_s14, %s27_s27  }
  0x2b   : > { %p719_p8 = por %p867_p6, %p866_p4  ;;  %p434_p9 = scmp.lt.s32.totalorder %s602_s15, 2 }
  0x2c   : > { %s146_s21 = sand.u32 1, %s598_s14   ;;  %p869_p12 = pmov %p866_p4 }
  0x2d   : > { %s399_s24 = sshll.u32 %s146_s21, 5  ;;  %s411_s25 = sshll.u32 %s602_s15, 9 }
  0x2e   : > { %p36_p13 = por %p35_p2, %p869_p12  ;;  %s732_s22 = scalar_lea.hbm %s853_s0, %s411_s25 }
  0x2f   : > { %s150_s26 = scalar_lea.vmem [#allocation2], %s399_s24  ;;  %s147_s4 = scalar_lea.sflag [#allocation3], %s146_s21 }
  0x30   : > { %s158_s27 = sshll.u32 %s150_s26, 4  ;;  %p734_p11 = pnand %p434_p9, %p36_p13  ;;  %s738_s27 = int_to_ptr.vmem [resolvable:$true] %s158_s27 }
  0x31   : > { %s502_s5 = scalar_lea.hbm %s732_s22, 512  ;;  %s507_s8 = scalar_lea.hbm %s853_s0, 1024 }
  0x32   : > { %p503_p0 = scmp.ne.s32.totalorder %s732_s22, %s502_s5  ;;  %p504_p3 = pneg %p734_p11 }
  0x33   : > { %p508_p10 = scmp.lt.u32.totalorder %s732_s22, %s853_s0  ;;  %p509_p1 = scmp.lt.u32.totalorder %s507_s8, %s502_s5 }
  0x34   : > { %p505_p5 = pnand %p504_p3, %p503_p0  ;;  %p511_p4 = scmp.lt.u32.totalorder %s502_s5, %s732_s22 }
  0x35   : > { %p510_p2 = por %p509_p1, %p508_p10 }
  0x36   : > { %p506_p7 = pneg %p505_p5 }
  0x37   : > { %p512_p6 = por %p511_p4, %p510_p2 }
  0x39   : > { %p513_p9 = pnand %p512_p6, %p506_p7 }
  0x3b   : > { %516 = shalt.err (!%p513_p9)
}
  0x3c   : > { %s517_s21 = scalar_lea.vmem %s738_s27, 512  ;;  %s605_s24 = smov [#allocation2]  }
  0x3d   : > { %p518_p12 = scmp.ne.s32.totalorder %s738_s27, %s517_s21  ;;  %s522_s25 = sshll.u32 %s605_s24, 4  ;;  %s523_s25 = int_to_ptr.vmem [resolvable:$false] %s522_s25 }
  0x3e   : > { %s524_s28 = scalar_lea.vmem %s523_s25, 1024  ;;  %p525_p5 = scmp.lt.s32.totalorder %s738_s27, %s523_s25 }
  0x3f   : > { %p520_p13 = pnand %p518_p12, %p504_p3  ;;  %p526_p10 = scmp.lt.s32.totalorder %s524_s28, %s517_s21 }
  0x41   : > { %p521_p0 = pneg %p520_p13  ;;  %p527_p1 = por %p526_p10, %p525_p5 }
  0x43   : > { %p528_p2 = pnand %p527_p1, %p521_p0 }
  0x45   : > { %531 = shalt.err (!%p528_p2)
}
  0x46   : > { %428 = dma.hbm_to_vmem [thread:$0]  (!%p734_p11), %s732_s22, 512, %s738_s27, %s147_s4  }
  0x47   : > { %p871_p7 = scmp.ne.s32.totalorder %s862_s20, 0 }
  0x48   : > { %s768_s29 = sand.u32 (!%p871_p7), 1, %s594_s13   ;;  %p872_p3 = scmp.ne.s32.totalorder (!%p871_p7), %s860_s18, 0 }
  0x49   : > { %167 = sbr.rel (%p871_p7) target bundleno = 298 (0x12a), region = 32  ;;  %s403_s26 = sshll.u32 (!%p871_p7), %s768_s29, 5 }
  0x4a   : > { %s170_s5 = scalar_lea.sflag (!%p871_p7), [#allocation3], %s768_s29  ;;  %s173_s6 = scalar_lea.vmem (!%p871_p7), [#allocation2], %s403_s26 }
  0x50   : > { %577 = dma.done.wait (%p872_p3), %s170_s5, 512  }
  0x51   : > { %579 = vsyncadd (%p872_p3), %s170_s5, 4294966784  ;;  %p873_p11 = scmp.eq.s32.totalorder %s648_s16, 0 }
  0x53   : > { %581 = dma.done.wait (%p873_p11), [#allocation6], 64   ;;  %p874_p4 = pmov %p873_p11 }
  0x54   : > { %v782_v0 = vld [vmem:[%s173_s6] sm:$0xff]  ;;  %v784_v1 = vld [vmem:[%s173_s6 + $0x8] sm:$0xff]  ;;  %v786_v2 = vld [vmem:[%s173_s6 + $0x10] sm:$0xff]  ;;  %v243_v27 = vlaneseq  ;;  %s412_s22 = sshll.u32 %s648_s16, 9  ;;  %s199_s27 = scalar_lea.vmem [#allocation7], %s403_s26 }
  0x55   : > { %583 = vsyncadd (%p874_p4), [#allocation6], 4294967232  ;;  %v204_v3 = vadd.f32 %v784_v1, %v782_v0  ;;  %v209_v4 = vmul.f32 %v782_v0, %v782_v0  ;;  %v210_v5 = vmul.f32 %v784_v1, %v784_v1  ;;  %v211_v6 = vmul.f32 %v786_v2, %v786_v2  ;;  %v203_v7 = vld [vmem:[%s173_s6 + $0x18] sm:$0xff]  ;;  %v236_v30 = vld [vmem:[#allocation5] sm:$0xf]  ;;  %s315_s30 = sshll.u32 %s199_s27, 4  ;;  %s809_s8 = scalar_lea.hbm %s856_s3, %s412_s22  ;;  %s811_s30 = int_to_ptr.vmem [resolvable:$true] %s315_s30 }
  0x56   : > { %v212_v9 = vmul.f32 %v203_v7, %v203_v7  ;;  %v244_v28 = vshrl.u32 %v243_v27, 7  ;;  %v237_v36 = vld [vmem:[%s855_s2] sm:$0xf]  ;;  %s301_s16 = scalar_lea.sflag [#allocation4], %s768_s29  ;;  %s532_s9 = scalar_lea.vmem %s811_s30, 512 }
  0x57   : > { %v205_v8 = vadd.f32 %v204_v3, %v786_v2  ;;  %v213_v10 = vadd.f32 %v210_v5, %v209_v4  ;;  %p533_p6 = scmp.ne.s32.totalorder %s811_s30, %s532_s9  ;;  %s606_s10 = smov [#allocation7]  }
  0x58   : > { %v245_v29 = vsub.s32 0, %v244_v28  ;;  %v249_v31 = vsub.s32 1, %v244_v28  ;;  %v253_v32 = vsub.s32 2, %v244_v28  ;;  %v257_v33 = vsub.s32 3, %v244_v28  ;;  %s536_s21 = sshll.u32 %s606_s10, 4  ;;  %s537_s21 = int_to_ptr.vmem [resolvable:$false] %s536_s21 }
  0x59   : > { %v206_v11 = vadd.f32 %v205_v8, %v203_v7  ;;  %v214_v12 = vadd.f32 %v213_v10, %v211_v6  ;;  %p534_p9 = pnand %p533_p6, %p719_p8  ;;  %s538_s24 = scalar_lea.vmem %s537_s21, 1024 }
  0x5a   : > { %v246_v37 = vrot.slane %v236_v30, %v245_v29  ;;  %v250_v39 = vrot.slane %v236_v30, %v249_v31  ;;  %v254_v40 = vrot.slane %v236_v30, %v253_v32  ;;  %v258_v41 = vrot.slane %v236_v30, %v257_v33  ;;  %p539_p13 = scmp.lt.s32.totalorder %s811_s30, %s537_s21  ;;  %p540_p0 = scmp.lt.s32.totalorder %s538_s24, %s532_s9 }
  0x5b   : > { %207 = vadd.xlane.f32.xlu0 %v206_v11  ;;  %v215_v13 = vadd.f32 %v214_v12, %v212_v9  ;;  %v275_v42 = vrot.slane %v237_v36, %v245_v29  ;;  %v279_v44 = vrot.slane %v237_v36, %v249_v31  ;;  %v283_v45 = vrot.slane %v237_v36, %v253_v32  ;;  %p535_p12 = pneg %p534_p9 }
  0x5c   : > { %v287_v46 = vrot.slane %v237_v36, %v257_v33  ;;  %p541_p5 = por %p540_p0, %p539_p13 }
  0x5e   : > { %p542_p10 = pnand %p541_p5, %p535_p12 }
  0x5f   : > { %216 = vadd.xlane.f32.xlu0 %v215_v13 }
  0xe8   : > { %v208_v14 = vpop.xlane.xlu0 %207 }
  0xe9   : > { %v218_v15 = vmul.f32 0.001953125, %v208_v14 }
  0xeb   : > { %v219_v16 = vmul.f32 %v218_v15, %v208_v14  ;;  %v238_v47 = vsub.f32 %v782_v0, %v218_v15  ;;  %v239_v48 = vsub.f32 %v784_v1, %v218_v15  ;;  %v240_v49 = vsub.f32 %v786_v2, %v218_v15 }
  0xec   : > { %v217_v17 = vpop.xlane.xlu0 %216  ;;  %v241_v50 = vsub.f32 %v203_v7, %v218_v15 }
  0xed   : > { %v220_v18 = vsub.f32 %v217_v17, %v219_v16 }
  0xef   : > { %v222_v19 = vmul.f32 0.0019569471, %v220_v18 }
  0xf1   : > { %v223_v20 = vmax.f32 %v222_v19, 0.0 }
  0xf3   : > { %470 = vrsqrt.f32 %v223_v20  ;;  %vm226_vm0 = vcmp.eq.f32.partialorder %v223_v20, inf  ;;  %v229_v23 = vand.u32 2147483648, %v223_v20  ;;  %vm228_vm1 = vcmp.eq.f32.partialorder %v223_v20, 0.0 }
  0xfd   : > { %v471_v21 = vpop.eup %470 }
  0xfe   : > { %v225_v22 = vmul.f32 %v471_v21, %v223_v20 }
 0x100   : > { %v227_v24 = vsel %vm226_vm0, %v223_v20, %v225_v22 }
 0x101   : > { %v230_v25 = vsel %vm228_vm1, %v229_v23, %v227_v24 }
 0x102   : > { %v231_v26 = vadd.f32 1e-06, %v230_v25 }
 0x104   : > { %472 = vrcp.f32 %v231_v26 }
 0x10e   : > { %v473_v34 = vpop.eup %472 }
 0x10f   : > { %v233_v35 = vmul.f32 %v473_v34, %v231_v26 }
 0x111   : > { %v234_v38 = vsub.f32 2.0, %v233_v35 }
 0x113   : > { %v235_v43 = vmul.f32 %v473_v34, %v234_v38 }
 0x115   : > { %v263_v51 = vmul.f32 %v246_v37, %v235_v43  ;;  %v264_v52 = vmul.f32 %v250_v39, %v235_v43  ;;  %v265_v53 = vmul.f32 %v254_v40, %v235_v43  ;;  %v266_v54 = vmul.f32 %v258_v41, %v235_v43 }
 0x117   : > { %v267_v55 = vmul.f32 %v263_v51, %v238_v47  ;;  %v268_v56 = vmul.f32 %v264_v52, %v239_v48  ;;  %v269_v57 = vmul.f32 %v265_v53, %v240_v49  ;;  %v270_v58 = vmul.f32 %v266_v54, %v241_v50 }
 0x119   : > { %v292_v59 = vadd.f32 %v275_v42, %v267_v55  ;;  %v293_v60 = vadd.f32 %v279_v44, %v268_v56  ;;  %v294_v61 = vadd.f32 %v283_v45, %v269_v57  ;;  %v295_v62 = vadd.f32 %v287_v46, %v270_v58 }
 0x11b   : > { %296 = vst [vmem:[%s199_s27] sm:$0xff] %v292_v59  ;;  %297 = vst [vmem:[%s199_s27 + $0x8] sm:$0xff] %v293_v60 }
 0x11c   : > { %298 = vst [vmem:[%s199_s27 + $0x10] sm:$0xff] %v294_v61  ;;  %299 = vst [vmem:[%s199_s27 + $0x18] sm:$0xff] %v295_v62 }
 0x11d   : > { %545 = shalt.err (!%p542_p10)
}
 0x11e   : > { %s546_s25 = scalar_lea.hbm %s809_s8, 512  ;;  %s550_s26 = scalar_lea.hbm %s856_s3, 1024 }
 0x11f   : > { %p547_p1 = scmp.ne.s32.totalorder %s809_s8, %s546_s25  ;;  %p551_p3 = scmp.lt.u32.totalorder %s809_s8, %s856_s3 }
 0x120   : > { %p552_p11 = scmp.lt.u32.totalorder %s550_s26, %s546_s25  ;;  %p554_p6 = scmp.lt.u32.totalorder %s546_s25, %s809_s8 }
 0x121   : > { %p548_p2 = pnand %p547_p1, %p719_p8 }
 0x122   : > { %p553_p4 = por %p552_p11, %p551_p3 }
 0x123   : > { %p549_p7 = pneg %p548_p2 }
 0x124   : > { %p555_p9 = por %p554_p6, %p553_p4 }
 0x126   : > { %p556_p12 = pnand %p555_p9, %p549_p7 }
 0x128   : > { %559 = shalt.err (!%p556_p12)
}
 0x129   : > { %419 = dma.vmem_to_hbm [thread:$0]  (%p719_p8), %s811_s30, 512, %s809_s8, %s301_s16  }
 0x12a PF: > { %s327_s18 = sand.u32 1, %s590_s12   ;;  %p875_p13 = scmp.ne.s32.totalorder %s861_s19, 0 }
 0x12b   : > { %p876_p0 = scmp.ge.s32.totalorder %s602_s15, 2  ;;  %s328_s20 = scalar_lea.sflag [#allocation4], %s327_s18 }
 0x12d   : > { %p430_p5 = pnand %p876_p0, %p875_p13 }
 0x12f   : > { %585 = dma.done.wait (!%p430_p5), %s328_s20, 512  }
 0x130   : > { %587 = vsyncadd (!%p430_p5), %s328_s20, 4294966784  ;;  %p17_p10 = scmp.ge.s32.totalorder %s675_s23, 4   ;;  %s877_s12 = smov %s594_s13 }
 0x131   : > { %s878_s13 = smov %s598_s14  ;;  %s879_s14 = smov %s711_s11 }
 0x132   : > { %s880_s15 = smov %s675_s23  ;;  %19 = sbr.rel (!%p17_p10) target bundleno = 6 (0x6), region = 81 }
 0x139   :  { %333 = vsyncpa [#allocation3], 1 }
 0x13a   :  { %335 = vsyncpa [#allocation3 + $0x1], 1 }
 0x13b   :  { %336 = vsyncpa [#allocation6], 1 }
 0x13c   :  { %337 = vsyncpa [#allocation4], 1 }
 0x13d   :  { %339 = vsyncpa [#allocation4 + $0x1], 1 }

</bundles_post_ra>
